<compile_context>
chip_gen: v6e
topology: v6e:2x2x1
jax: 0.10.0
libtpu: 0.0.40
codegen_flags: <defaults>
</compile_context>

<pallas_src>
import numpy as np
import jax
import jax.numpy as jnp
from jax import lax
from jax.experimental import pallas as pl
from jax.experimental.pallas import tpu as pltpu

# ---------------- model hyper-parameters (TCN(**param)) ----------------
SEQ_LEN = 8
HORIZON = 3
INPUT_DIM = 4
OUTPUT_DIM = 1            # reshape(-1, output_dim) + shape assert => output_dim == 1
KERNEL_SIZE = 2           # K=2 assumed by the two-tap conv below
HIDDEN_DIMS = [8, 8]
DTYPE = jnp.float32
CPAD = ((max([INPUT_DIM] + HIDDEN_DIMS) + 7) // 8) * 8   # padded channel width (sublanes)
MAX_B_TILE = 128          # BL_tile = 1024 lanes per grid step


def _level_configs():
    cfgs = []
    in_c = INPUT_DIM
    for i, out_c in enumerate(HIDDEN_DIMS):
        cfgs.append(dict(cin=in_c, cout=out_c, d=2 ** i, has_ds=(in_c != out_c)))
        in_c = out_c
    return cfgs


def _pack_layout():
    """Row offsets of every CPAD-row parameter block inside the packed slab
    (weights stored transposed: (cout, cin) in rows[0:cout], lanes[0:cin])."""
    cfgs = _level_configs()
    offs = {}
    row = 0

    def alloc(key, nrows):
        nonlocal row
        offs[key] = row
        row += nrows

    for i, c in enumerate(cfgs):
        alloc(("w1_tap0", i), CPAD)              # tap applied to the shift-d input
        if c["has_ds"]:
            alloc(("w1_tap1_ds", i), 2 * CPAD)   # [shift-0 tap ; downsample] stacked
            alloc(("bd", i), CPAD)
        else:
            alloc(("w1_tap1", i), CPAD)
        alloc(("b1", i), CPAD)
        alloc(("w2_tap0", i), CPAD)
        alloc(("w2_tap1", i), CPAD)
        alloc(("b2", i), CPAD)
    alloc("bp", CPAD)
    return cfgs, offs, row


# ---------------- fused forward kernel ----------------
def make_fused_kernel(b_tile):
    cfgs, offs, _ = _pack_layout()
    L = SEQ_LEN
    BLt = b_tile * L
    pow2 = (L & (L - 1)) == 0

    def kernel(x_ref, p_ref, wp_ref, out_ref):
        f32 = jnp.float32

        # -- hoisted causal-shift machinery: one iota, one mask per distinct shift --
        lane = lax.broadcasted_iota(jnp.int32, (1, BLt), 1)
        seq_pos = (lane & (L - 1)) if pow2 else (lane % L)
        masks = {c["d"]: seq_pos >= c["d"] for c in cfgs}

        def shift(h, s):
            # h[:, j] -> h[:, j - s] within each length-L lane group, zero-filled.
            # roll wraps; wrapped lanes land exactly on masked (seq_pos < s) positions.
            return jnp.where(masks[s], pltpu.roll(h, s, 1), 0.0)

        def wblk(key, nrows=CPAD):
            o = offs[key]
            return p_ref[o:o + nrows, :]

        def bcolumn(key):
            o = offs[key]
            return p_ref[o:o + CPAD, 0:1]

        h = x_ref[...]                                            # (CPAD, BLt)
        for i, c in enumerate(cfgs):
            d = c["d"]
            h_sh = shift(h, d)
            b1 = bcolumn(("b1", i))
            if c["has_ds"]:
                # one MXU push yields conv1's shift-0 tap AND the 1x1 residual proj
                y2 = jnp.dot(wblk(("w1_tap1_ds", i), 2 * CPAD), h,
                             preferred_element_type=f32)          # (2*CPAD, BLt)
                conv1 = (jnp.dot(wblk(("w1_tap0", i)), h_sh,
                                 preferred_element_type=f32) + y2[:CPAD, :] + b1)
                res = y2[CPAD:, :] + bcolumn(("bd", i))
            else:
                conv1 = (jnp.dot(wblk(("w1_tap0", i)), h_sh, preferred_element_type=f32)
                         + jnp.dot(wblk(("w1_tap1", i)), h, preferred_element_type=f32)
                         + b1)
                res = h
            o1 = jnp.maximum(conv1, 0.0)
            o1_sh = shift(o1, d)
            conv2 = (jnp.dot(wblk(("w2_tap0", i)), o1_sh, preferred_element_type=f32)
                     + jnp.dot(wblk(("w2_tap1", i)), o1, preferred_element_type=f32)
                     + bcolumn(("b2", i)))
            h = jnp.maximum(jnp.maximum(conv2, 0.0) + res, 0.0)   # (CPAD, BLt)

        # -- predictor (last horizon only), vectorized over the whole tile --
        t = h * wp_ref[...]                                       # (CPAD, BLt)  VPU
        jrow = lax.broadcasted_iota(jnp.int32, (BLt, b_tile), 0)
        bc = lax.broadcasted_iota(jnp.int32, (BLt, b_tile), 1)
        lo = bc * L
        seg = jnp.where((jrow >= lo) & (jrow < lo + L), 1.0, 0.0).astype(f32)
        pc = jnp.dot(t, seg, preferred_element_type=f32)          # (CPAD, b_tile) MXU
        bp = p_ref[offs["bp"]:offs["bp"] + 1, 0:1]                # (1, 1)
        pred = jnp.sum(pc, axis=0, keepdims=True) + bp            # (1, b_tile) lane-dense
        out_ref[...] = pred.reshape(1, 1, b_tile).astype(out_ref.dtype)

    return kernel


def tcn_forward(x, P, WpT):
    B = x.shape[0]
    xs = x[:, -SEQ_LEN:, -INPUT_DIM:].astype(DTYPE)               # (B, L, Cin)
    if B <= MAX_B_TILE:
        b_tile, b_pad = B, B
    else:
        b_tile = MAX_B_TILE
        b_pad = ((B + b_tile - 1) // b_tile) * b_tile
    n_tiles = b_pad // b_tile
    # channels -> sublanes (padded to CPAD), batch*time -> lanes (lane-dense layout)
    xs = jnp.pad(xs, ((0, b_pad - B), (0, 0), (0, CPAD - INPUT_DIM)))
    x_t = jnp.transpose(xs, (2, 0, 1)).reshape(CPAD, b_pad * SEQ_LEN)
    wp_tiled = jnp.tile(WpT, (1, b_tile))                         # (CPAD, b_tile*L)
    # TODO(synk): for very large batch the x_t DMA dominates; pass it as bf16 and
    # upcast in-kernel to halve HBM traffic (weights stay f32).
    out = pl.pallas_call(
        make_fused_kernel(b_tile),
        out_shape=jax.ShapeDtypeStruct((n_tiles, 1, b_tile), DTYPE),
        grid=(n_tiles,),
        in_specs=[
            pl.BlockSpec((CPAD, b_tile * SEQ_LEN), lambda i: (0, i)),
            pl.BlockSpec(P.shape, lambda i: (0, 0)),
            pl.BlockSpec((CPAD, b_tile * SEQ_LEN), lambda i: (0, 0)),
        ],
        out_specs=pl.BlockSpec((1, 1, b_tile), lambda i: (i, 0, 0)),
        compiler_params=pltpu.CompilerParams(dimension_semantics=("parallel",)),
    )(x_t, P, wp_tiled)
    return out.reshape(b_pad)[:B].reshape(B, OUTPUT_DIM)


# ---------------- parameter init (deterministic, synthetic) ----------------
def init_params(key):
    params = {"blocks": []}
    in_c = INPUT_DIM
    for i, out_c in enumerate(HIDDEN_DIMS):
        key, k1, k2, k3, k4, k5, k6 = jax.random.split(key, 7)
        w1 = 0.1 * jax.random.normal(k1, (KERNEL_SIZE, in_c, out_c), DTYPE)
        b1 = 0.1 * jax.random.normal(k2, (1, out_c), DTYPE)
        w2 = 0.1 * jax.random.normal(k3, (KERNEL_SIZE, out_c, out_c), DTYPE)
        b2 = 0.1 * jax.random.normal(k4, (1, out_c), DTYPE)
        if in_c != out_c:
            wd = 0.1 * jax.random.normal(k5, (in_c, out_c), DTYPE)
            bd = 0.1 * jax.random.normal(k6, (1, out_c), DTYPE)
        else:
            wd = bd = None
        params["blocks"].append((w1, b1, w2, b2, wd, bd))
        in_c = out_c
    key, kp, kb = jax.random.split(key, 3)
    wp = 0.1 * jax.random.normal(kp, (HORIZON, SEQ_LEN, HIDDEN_DIMS[-1]), DTYPE)
    bp = 0.1 * jax.random.normal(kb, (1, HORIZON), DTYPE)
    params["predictor"] = (wp, bp)
    return params


def pack_params(params):
    """Pack all weights/biases (transposed, weight-norm folded) into one slab +
    the last-horizon predictor weight (host side, once)."""
    cfgs, offs, nrows = _pack_layout()
    P = np.zeros((nrows, CPAD), np.float32)

    def put_w(key, w_t):                       # w_t: (cout, cin) transposed weight
        o = offs[key]
        P[o:o + w_t.shape[0], :w_t.shape[1]] = w_t

    def put_b(key, b):
        o = offs[key]
        b = np.asarray(b).reshape(-1)
        P[o:o + b.size, 0] = b

    for i, (cfg, (w1, b1, w2, b2, wd, bd)) in enumerate(zip(cfgs, params["blocks"])):
        w1 = np.asarray(w1); w2 = np.asarray(w2)
        put_w(("w1_tap0", i), w1[0].T)                      # tap with shift = d
        if cfg["has_ds"]:
            o = offs[("w1_tap1_ds", i)]
            t1 = w1[1].T                                    # tap with shift = 0
            wdt = np.asarray(wd).T
            P[o:o + t1.shape[0], :t1.shape[1]] = t1
            P[o + CPAD:o + CPAD + wdt.shape[0], :wdt.shape[1]] = wdt
            put_b(("bd", i), bd)
        else:
            put_w(("w1_tap1", i), w1[1].T)
        put_b(("b1", i), b1)
        put_w(("w2_tap0", i), w2[0].T)
        put_w(("w2_tap1", i), w2[1].T)
        put_b(("b2", i), b2)
    wp, bp = params["predictor"]
    P[offs["bp"], 0] = np.asarray(bp)[0, -1]                # last-horizon bias
    WpT = np.zeros((CPAD, SEQ_LEN), np.float32)
    WpT[:HIDDEN_DIMS[-1], :] = np.asarray(wp)[-1].T         # last-horizon weight (C, L)
    return jnp.asarray(P), jnp.asarray(WpT)


# ---------------- independent pure-JAX reference ----------------
def ref_causal_conv(x, w, b, d):
    pad = (w.shape[0] - 1) * d
    y = lax.conv_general_dilated(x, w, window_strides=(1,), padding=[(pad, 0)],
                                 rhs_dilation=(d,),
                                 dimension_numbers=("NWC", "WIO", "NWC"))
    return y + b


def ref_forward(x, params):
    x = x[:, -SEQ_LEN:, -INPUT_DIM:].astype(DTYPE)
    h = x
    for i, (w1, b1, w2, b2, wd, bd) in enumerate(params["blocks"]):
        d = 2 ** i
        o = jax.nn.relu(ref_causal_conv(h, w1, b1, d))
        o = jax.nn.relu(ref_causal_conv(o, w2, b2, d))
        res = h if wd is None else jnp.einsum("blc,cd->bld", h, wd) + bd
        h = jax.nn.relu(o + res)
    wp, bp = params["predictor"]
    pred = jnp.einsum("blc,hlc->bh", h, wp) + bp
    return pred[:, -1:].reshape(-1, OUTPUT_DIM)


if __name__ == "__main__":
    key = jax.random.PRNGKey(0)
    kx, kp = jax.random.split(key)
    # forward accepts (batch, seq, features) and slices to the last seq_len / input_dim
    x = jax.random.normal(kx, (2, 12, 6), DTYPE)
    params = init_params(kp)
    P, WpT = pack_params(params)

    fwd = jax.jit(tcn_forward)
    out = jax.block_until_ready(fwd(x, P, WpT))

    ref = ref_forward(x, params)
    assert out.shape == (x.shape[0], OUTPUT_DIM)
    np.testing.assert_allclose(np.asarray(out), np.asarray(ref), rtol=1e-5, atol=1e-5)
    print("KERNEL_OK")
</pallas_src>

<mosaic_0001>
module attributes {stable_mosaic.version = 11 : i64} {
  func.func @kernel(%arg0: i32, %arg1: memref<8x16xf32, #tpu.memory_space<vmem>>, %arg2: memref<120x8xf32, #tpu.memory_space<vmem>>, %arg3: memref<8x16xf32, #tpu.memory_space<vmem>>, %arg4: memref<1x1x2xf32, #tpu.memory_space<vmem>>) attributes {dimension_semantics = [#tpu.dimension_semantics<parallel>], iteration_bounds = array<i64: 1>, scalar_prefetch = 0 : i64, scratch_operands = 0 : i64, tpu.core_type = #tpu.core_type<tc>, window_params = [{transform_indices = @transform_0, window_bounds = array<i64: 8, 16>}, {pipeline_mode = #tpu.pipeline_mode<synchronous>, transform_indices = @transform_1, window_bounds = array<i64: 120, 8>}, {pipeline_mode = #tpu.pipeline_mode<synchronous>, transform_indices = @transform_2, window_bounds = array<i64: 8, 16>}, {transform_indices = @transform_3, window_bounds = array<i64: 1, 1, 2>}]} {
    %0 = tpu.iota {dimensions = array<i32: 1>} : vector<1x16xi32>
    %c7_i32 = arith.constant 7 : i32
    %1 = vector.broadcast %c7_i32 : i32 to vector<1x16xi32>
    %2 = arith.andi %0, %1 : vector<1x16xi32>
    %c1_i32 = arith.constant 1 : i32
    %3 = vector.broadcast %c1_i32 : i32 to vector<1x16xi32>
    %4 = arith.cmpi sge, %2, %3 : vector<1x16xi32>
    %c2_i32 = arith.constant 2 : i32
    %5 = vector.broadcast %c2_i32 : i32 to vector<1x16xi32>
    %6 = arith.cmpi sge, %2, %5 : vector<1x16xi32>
    %c0 = arith.constant 0 : index
    %c0_0 = arith.constant 0 : index
    %7 = vector.load %arg1[%c0, %c0_0] : memref<8x16xf32, #tpu.memory_space<vmem>>, vector<8x16xf32>
    %c1_i32_1 = arith.constant 1 : i32
    %8 = tpu.dynamic_rotate %7 by %c1_i32_1 dim 1 : vector<8x16xf32>, i32 -> vector<8x16xf32>
    %cst = arith.constant 0.000000e+00 : f32
    %9 = vector.shape_cast %4 : vector<1x16xi1> to vector<1x16xi1>
    %10 = vector.broadcast %9 : vector<1x16xi1> to vector<8x16xi1>
    %11 = vector.broadcast %cst : f32 to vector<8x16xf32>
    %12 = arith.select %10, %8, %11 : vector<8x16xi1>, vector<8x16xf32>
    %c32 = arith.constant 32 : index
    %c0_2 = arith.constant 0 : index
    %13 = vector.load %arg2[%c32, %c0_2] : memref<120x8xf32, #tpu.memory_space<vmem>>, vector<8x1xf32>
    %c8 = arith.constant 8 : index
    %c0_3 = arith.constant 0 : index
    %14 = vector.load %arg2[%c8, %c0_3] : memref<120x8xf32, #tpu.memory_space<vmem>>, vector<16x8xf32>
    %cst_4 = arith.constant dense<0.000000e+00> : vector<16x16xf32>
    %15 = tpu.matmul %14, %7, %cst_4 {dimension_numbers = #tpu.dot_dimension_numbers<[1], [0], [0], [1], [0, 0, 1, 1], [], []>} : vector<16x8xf32>, vector<8x16xf32>, vector<16x16xf32> -> vector<16x16xf32>
    %c0_5 = arith.constant 0 : index
    %c0_6 = arith.constant 0 : index
    %16 = vector.load %arg2[%c0_5, %c0_6] : memref<120x8xf32, #tpu.memory_space<vmem>>, vector<8x8xf32>
    %cst_7 = arith.constant dense<0.000000e+00> : vector<8x16xf32>
    %17 = tpu.matmul %16, %12, %cst_7 {dimension_numbers = #tpu.dot_dimension_numbers<[1], [0], [0], [1], [0, 0, 1, 1], [], []>} : vector<8x8xf32>, vector<8x16xf32>, vector<8x16xf32> -> vector<8x16xf32>
    %18 = vector.extract_strided_slice %15 {offsets = [0, 0], sizes = [8, 16], strides = [1, 1]} : vector<16x16xf32> to vector<8x16xf32>
    %19 = arith.addf %17, %18 : vector<8x16xf32>
    %20 = vector.broadcast %13 : vector<8x1xf32> to vector<8x16xf32>
    %21 = arith.addf %19, %20 : vector<8x16xf32>
    %22 = vector.extract_strided_slice %15 {offsets = [8, 0], sizes = [8, 16], strides = [1, 1]} : vector<16x16xf32> to vector<8x16xf32>
    %c24 = arith.constant 24 : index
    %c0_8 = arith.constant 0 : index
    %23 = vector.load %arg2[%c24, %c0_8] : memref<120x8xf32, #tpu.memory_space<vmem>>, vector<8x1xf32>
    %24 = vector.broadcast %23 : vector<8x1xf32> to vector<8x16xf32>
    %25 = arith.addf %22, %24 : vector<8x16xf32>
    %cst_9 = arith.constant 0.000000e+00 : f32
    %26 = vector.broadcast %cst_9 : f32 to vector<8x16xf32>
    %27 = arith.maximumf %21, %26 : vector<8x16xf32>
    %c1_i32_10 = arith.constant 1 : i32
    %28 = tpu.dynamic_rotate %27 by %c1_i32_10 dim 1 : vector<8x16xf32>, i32 -> vector<8x16xf32>
    %cst_11 = arith.constant 0.000000e+00 : f32
    %29 = vector.shape_cast %4 : vector<1x16xi1> to vector<1x16xi1>
    %30 = vector.broadcast %29 : vector<1x16xi1> to vector<8x16xi1>
    %31 = vector.broadcast %cst_11 : f32 to vector<8x16xf32>
    %32 = arith.select %30, %28, %31 : vector<8x16xi1>, vector<8x16xf32>
    %c40 = arith.constant 40 : index
    %c0_12 = arith.constant 0 : index
    %33 = vector.load %arg2[%c40, %c0_12] : memref<120x8xf32, #tpu.memory_space<vmem>>, vector<8x8xf32>
    %cst_13 = arith.constant dense<0.000000e+00> : vector<8x16xf32>
    %34 = tpu.matmul %33, %32, %cst_13 {dimension_numbers = #tpu.dot_dimension_numbers<[1], [0], [0], [1], [0, 0, 1, 1], [], []>} : vector<8x8xf32>, vector<8x16xf32>, vector<8x16xf32> -> vector<8x16xf32>
    %c48 = arith.constant 48 : index
    %c0_14 = arith.constant 0 : index
    %35 = vector.load %arg2[%c48, %c0_14] : memref<120x8xf32, #tpu.memory_space<vmem>>, vector<8x8xf32>
    %cst_15 = arith.constant dense<0.000000e+00> : vector<8x16xf32>
    %36 = tpu.matmul %35, %27, %cst_15 {dimension_numbers = #tpu.dot_dimension_numbers<[1], [0], [0], [1], [0, 0, 1, 1], [], []>} : vector<8x8xf32>, vector<8x16xf32>, vector<8x16xf32> -> vector<8x16xf32>
    %37 = arith.addf %34, %36 : vector<8x16xf32>
    %c56 = arith.constant 56 : index
    %c0_16 = arith.constant 0 : index
    %38 = vector.load %arg2[%c56, %c0_16] : memref<120x8xf32, #tpu.memory_space<vmem>>, vector<8x1xf32>
    %39 = vector.broadcast %38 : vector<8x1xf32> to vector<8x16xf32>
    %40 = arith.addf %37, %39 : vector<8x16xf32>
    %cst_17 = arith.constant 0.000000e+00 : f32
    %41 = vector.broadcast %cst_17 : f32 to vector<8x16xf32>
    %42 = arith.maximumf %40, %41 : vector<8x16xf32>
    %43 = arith.addf %42, %25 : vector<8x16xf32>
    %cst_18 = arith.constant 0.000000e+00 : f32
    %44 = vector.broadcast %cst_18 : f32 to vector<8x16xf32>
    %45 = arith.maximumf %43, %44 : vector<8x16xf32>
    %c2_i32_19 = arith.constant 2 : i32
    %46 = tpu.dynamic_rotate %45 by %c2_i32_19 dim 1 : vector<8x16xf32>, i32 -> vector<8x16xf32>
    %cst_20 = arith.constant 0.000000e+00 : f32
    %47 = vector.shape_cast %6 : vector<1x16xi1> to vector<1x16xi1>
    %48 = vector.broadcast %47 : vector<1x16xi1> to vector<8x16xi1>
    %49 = vector.broadcast %cst_20 : f32 to vector<8x16xf32>
    %50 = arith.select %48, %46, %49 : vector<8x16xi1>, vector<8x16xf32>
    %c80 = arith.constant 80 : index
    %c0_21 = arith.constant 0 : index
    %51 = vector.load %arg2[%c80, %c0_21] : memref<120x8xf32, #tpu.memory_space<vmem>>, vector<8x1xf32>
    %c64 = arith.constant 64 : index
    %c0_22 = arith.constant 0 : index
    %52 = vector.load %arg2[%c64, %c0_22] : memref<120x8xf32, #tpu.memory_space<vmem>>, vector<8x8xf32>
    %cst_23 = arith.constant dense<0.000000e+00> : vector<8x16xf32>
    %53 = tpu.matmul %52, %50, %cst_23 {dimension_numbers = #tpu.dot_dimension_numbers<[1], [0], [0], [1], [0, 0, 1, 1], [], []>} : vector<8x8xf32>, vector<8x16xf32>, vector<8x16xf32> -> vector<8x16xf32>
    %c72 = arith.constant 72 : index
    %c0_24 = arith.constant 0 : index
    %54 = vector.load %arg2[%c72, %c0_24] : memref<120x8xf32, #tpu.memory_space<vmem>>, vector<8x8xf32>
    %cst_25 = arith.constant dense<0.000000e+00> : vector<8x16xf32>
    %55 = tpu.matmul %54, %45, %cst_25 {dimension_numbers = #tpu.dot_dimension_numbers<[1], [0], [0], [1], [0, 0, 1, 1], [], []>} : vector<8x8xf32>, vector<8x16xf32>, vector<8x16xf32> -> vector<8x16xf32>
    %56 = arith.addf %53, %55 : vector<8x16xf32>
    %57 = vector.broadcast %51 : vector<8x1xf32> to vector<8x16xf32>
    %58 = arith.addf %56, %57 : vector<8x16xf32>
    %cst_26 = arith.constant 0.000000e+00 : f32
    %59 = vector.broadcast %cst_26 : f32 to vector<8x16xf32>
    %60 = arith.maximumf %58, %59 : vector<8x16xf32>
    %c2_i32_27 = arith.constant 2 : i32
    %61 = tpu.dynamic_rotate %60 by %c2_i32_27 dim 1 : vector<8x16xf32>, i32 -> vector<8x16xf32>
    %cst_28 = arith.constant 0.000000e+00 : f32
    %62 = vector.shape_cast %6 : vector<1x16xi1> to vector<1x16xi1>
    %63 = vector.broadcast %62 : vector<1x16xi1> to vector<8x16xi1>
    %64 = vector.broadcast %cst_28 : f32 to vector<8x16xf32>
    %65 = arith.select %63, %61, %64 : vector<8x16xi1>, vector<8x16xf32>
    %c88 = arith.constant 88 : index
    %c0_29 = arith.constant 0 : index
    %66 = vector.load %arg2[%c88, %c0_29] : memref<120x8xf32, #tpu.memory_space<vmem>>, vector<8x8xf32>
    %cst_30 = arith.constant dense<0.000000e+00> : vector<8x16xf32>
    %67 = tpu.matmul %66, %65, %cst_30 {dimension_numbers = #tpu.dot_dimension_numbers<[1], [0], [0], [1], [0, 0, 1, 1], [], []>} : vector<8x8xf32>, vector<8x16xf32>, vector<8x16xf32> -> vector<8x16xf32>
    %c96 = arith.constant 96 : index
    %c0_31 = arith.constant 0 : index
    %68 = vector.load %arg2[%c96, %c0_31] : memref<120x8xf32, #tpu.memory_space<vmem>>, vector<8x8xf32>
    %cst_32 = arith.constant dense<0.000000e+00> : vector<8x16xf32>
    %69 = tpu.matmul %68, %60, %cst_32 {dimension_numbers = #tpu.dot_dimension_numbers<[1], [0], [0], [1], [0, 0, 1, 1], [], []>} : vector<8x8xf32>, vector<8x16xf32>, vector<8x16xf32> -> vector<8x16xf32>
    %70 = arith.addf %67, %69 : vector<8x16xf32>
    %c104 = arith.constant 104 : index
    %c0_33 = arith.constant 0 : index
    %71 = vector.load %arg2[%c104, %c0_33] : memref<120x8xf32, #tpu.memory_space<vmem>>, vector<8x1xf32>
    %72 = vector.broadcast %71 : vector<8x1xf32> to vector<8x16xf32>
    %73 = arith.addf %70, %72 : vector<8x16xf32>
    %cst_34 = arith.constant 0.000000e+00 : f32
    %74 = vector.broadcast %cst_34 : f32 to vector<8x16xf32>
    %75 = arith.maximumf %73, %74 : vector<8x16xf32>
    %76 = arith.addf %75, %45 : vector<8x16xf32>
    %cst_35 = arith.constant 0.000000e+00 : f32
    %77 = vector.broadcast %cst_35 : f32 to vector<8x16xf32>
    %78 = arith.maximumf %76, %77 : vector<8x16xf32>
    %c0_36 = arith.constant 0 : index
    %c0_37 = arith.constant 0 : index
    %79 = vector.load %arg3[%c0_36, %c0_37] : memref<8x16xf32, #tpu.memory_space<vmem>>, vector<8x16xf32>
    %80 = arith.mulf %78, %79 : vector<8x16xf32>
    %81 = tpu.iota {dimensions = array<i32: 0>} : vector<16x2xi32>
    %82 = tpu.iota {dimensions = array<i32: 1>} : vector<16x2xi32>
    %c8_i32 = arith.constant 8 : i32
    %83 = vector.broadcast %c8_i32 : i32 to vector<16x2xi32>
    %84 = arith.muli %82, %83 : vector<16x2xi32>
    %85 = arith.cmpi sge, %81, %84 : vector<16x2xi32>
    %c8_i32_38 = arith.constant 8 : i32
    %86 = vector.broadcast %c8_i32_38 : i32 to vector<16x2xi32>
    %87 = arith.addi %84, %86 : vector<16x2xi32>
    %88 = arith.cmpi slt, %81, %87 : vector<16x2xi32>
    %89 = arith.andi %85, %88 : vector<16x2xi1>
    %cst_39 = arith.constant 1.000000e+00 : f32
    %cst_40 = arith.constant 0.000000e+00 : f32
    %90 = vector.broadcast %cst_39 : f32 to vector<16x2xf32>
    %91 = vector.broadcast %cst_40 : f32 to vector<16x2xf32>
    %92 = arith.select %89, %90, %91 : vector<16x2xi1>, vector<16x2xf32>
    %cst_41 = arith.constant dense<0.000000e+00> : vector<8x2xf32>
    %93 = tpu.matmul %80, %92, %cst_41 {dimension_numbers = #tpu.dot_dimension_numbers<[1], [0], [0], [1], [0, 0, 1, 1], [], []>} : vector<8x16xf32>, vector<16x2xf32>, vector<8x2xf32> -> vector<8x2xf32>
    %c112 = arith.constant 112 : index
    %c0_42 = arith.constant 0 : index
    %94 = vector.load %arg2[%c112, %c0_42] : memref<120x8xf32, #tpu.memory_space<vmem>>, vector<1x1xf32>
    %cst_43 = arith.constant dense<0.000000e+00> : vector<2xf32>
    %95 = vector.multi_reduction <add>, %93, %cst_43 [0] : vector<8x2xf32> to vector<2xf32>
    %96 = vector.shape_cast %95 : vector<2xf32> to vector<1x2xf32>
    %97 = vector.broadcast %94 : vector<1x1xf32> to vector<1x2xf32>
    %98 = arith.addf %96, %97 : vector<1x2xf32>
    %99 = vector.shape_cast %98 : vector<1x2xf32> to vector<1x1x2xf32>
    %c0_44 = arith.constant 0 : index
    %c0_45 = arith.constant 0 : index
    %c0_46 = arith.constant 0 : index
    %100 = vector.load %arg4[%c0_44, %c0_45, %c0_46] : memref<1x1x2xf32, #tpu.memory_space<vmem>>, vector<1x1x2xf32>
    tpu.vector_store %arg4[%c0_44, %c0_45, %c0_46], %99 {strides = array<i32>} : memref<1x1x2xf32, #tpu.memory_space<vmem>>, vector<1x1x2xf32>,
    return
  }
  func.func @transform_0(%arg0: i32) -> (i32, i32) {
    %c0_i32 = arith.constant 0 : i32
    %c0_i32_0 = arith.constant 0 : i32
    return %c0_i32, %arg0 : i32, i32
  }
  func.func @transform_1(%arg0: i32) -> (i32, i32) {
    %c0_i32 = arith.constant 0 : i32
    %c0_i32_0 = arith.constant 0 : i32
    %c0_i32_1 = arith.constant 0 : i32
    return %c0_i32, %c0_i32_0 : i32, i32
  }
  func.func @transform_2(%arg0: i32) -> (i32, i32) {
    %c0_i32 = arith.constant 0 : i32
    %c0_i32_0 = arith.constant 0 : i32
    %c0_i32_1 = arith.constant 0 : i32
    return %c0_i32, %c0_i32_0 : i32, i32
  }
  func.func @transform_3(%arg0: i32) -> (i32, i32, i32) {
    %c0_i32 = arith.constant 0 : i32
    %c0_i32_0 = arith.constant 0 : i32
    %c0_i32_1 = arith.constant 0 : i32
    return %arg0, %c0_i32, %c0_i32_0 : i32, i32, i32
  }
}

</mosaic_0001>

<bundles_post_ra>
// kernel: tcn_forward.1
= control target key start
LH: loop header
LB: loop body
LE: loop exit
PB: predicated region body
PF: predicated region fallthrough
CT: control target
= control target key end

     0   :  { %s1117_s0 = inlined_call_operand.vmem [shape: f32[8,16], index: 0, kind: input, shape index: {}]   ;;  %s1118_s1 = inlined_call_operand.vmem [shape: f32[120,8], index: 1, kind: input, shape index: {}]   ;;  %s1119_s2 = inlined_call_operand.vmem [shape: f32[8,16], index: 2, kind: input, shape index: {}]   ;;  %s1120_s3 = inlined_call_operand.hbm [shape: f32[1,1,2], index: 3, kind: output, shape index: {}]  }
   0x1   :  { %v20_v0 = vld [vmem:[%s1117_s0] sm:$0xff] }
   0x2   :  { %8 = vsyncpa [#allocation3], 0  ;;  %s950_s14 = smov 16   ;;  %871 = vmatprep.subr.mxu0 %v20_v0  ;;  %v36_v1 = vld [vmem:[%s1118_s1 + $0x8] sm:$0xff]  ;;  %vm38_vm0 = vcmask 64512   ;;  %v37_v2 = vld [vmem:[%s1118_s1 + $0x10] sm:$0xff]  ;;  %v15_v10 = vlaneseq }
   0x3   :  { %22 = vrot.lane.b32.xlu0 %v20_v0, %s950_s14  ;;  %872 = vmatpush3.msra.mxu0 %v20_v0  ;;  %v951_v3 = vmov 0.0   ;;  %vm21_vm1 = vcmask 1047680   ;;  %vm952_vm2 = vmmov 0   ;;  %v953_v6 = vmov 0   ;;  %s954_s0 = smov 113   ;;  %v35_v9 = vld [vmem:[%s1118_s1 + $0x20] sm:$0xff] }
   0x4   :  { %873 = vmatprep.mubr.msk.f32.mxu0 %vm38_vm0, %v36_v1  ;;  %876 = vmatprep.subr.mxu1 %v951_v3  ;;  %v1004_v11 = vand.u32 127, %v15_v10  ;;  %v120_v14 = vld [vmem:[%s1118_s1] sm:$0xff]  ;;  %v367_v26 = vld [vmem:[%s1118_s1 + $0x38] sm:$0xff]  ;;  %v220_v27 = vld [vmem:[%s1118_s1 + $0x30] sm:$0xff]  ;;  %s955_s8 = smov 114   ;;  %vm730_vm11 = vcmask 130048  }
   0x5   :  { %874 = vmatmul.mubr.msk.f32.vlgmr.msra.gmra.mxu0 %vm38_vm0, %v37_v2  ;;  %881 = vmatprep.subr.mxu0 %v951_v3  ;;  %v200_v30 = vld [vmem:[%s1118_s1 + $0x18] sm:$0xff]  ;;  %v219_v31 = vld [vmem:[%s1118_s1 + $0x28] sm:$0xff]  ;;  %v390_v47 = vld [vmem:[%s1118_s1 + $0x50] sm:$0xff]  ;;  %vm805_vm12 = vcmask 15360   ;;  %s957_s19 = smov [#allocation2]   ;;  %vm819_vm13 = vcmask 8192  }
   0x6   :  { %878 = vmatprep.mubr.msk.f32.mxu1 %vm952_vm2, %v951_v3  ;;  %883 = vmatprep.mubr.msk.f32.mxu0 %vm952_vm2, %v951_v3  ;;  %v17_v12 = vand.u32 7, %v1004_v11  ;;  %v392_v48 = vld [vmem:[%s1118_s1 + $0x48] sm:$0xff]  ;;  %v391_v52 = vld [vmem:[%s1118_s1 + $0x40] sm:$0xff]  ;;  %v720_v13 = vmul.u32 8, %v1004_v11  ;;  %s827_s20 = sshll.u32 %s957_s19, 4  ;;  %s828_s20 = int_to_ptr.vmem [resolvable:$true] %s827_s20 }
   0x7   :  { %926 = vset.pattern.permute.xlu1 %v953_v6  ;;  %927 = vset.pattern.permute.xlu0 %v953_v6  ;;  %v558_v1 = vld [vmem:[%s1118_s1 + $0x60] sm:$0xff]  ;;  %v557_v6 = vld [vmem:[%s1118_s1 + $0x58] sm:$0xff]  ;;  %s932_s21 = scalar_lea.vmem %s828_s20, 32  ;;  %p933_p1 = scmp.lt.s32.totalorder %s828_s20, %s828_s20 }
   0x8   :  { %vm1009_vm3 = vcmp.ge.s32.totalorder %v17_v12, 1  ;;  %vm1071_vm4 = vcmp.ge.s32.totalorder %v17_v12, 2  ;;  %v718_v12 = vshrl.u32 %v15_v10, 7 }
   0xa   :  { %vm721_vm8 = vcmp.ge.s32.totalorder %v718_v12, %v720_v13 }
  0x75   :  { %v23_v4 = vpop.permute.xlu0 %22 }
  0x76   :  { %v24_v5 = vsel %vm21_vm1, %v23_v4, %v20_v0 }
  0x77   :  { %25 = vrot.lane.b32.xlu0 %v24_v5, %s950_s14  ;;  %v804_v5 = vld [vmem:[%s1118_s1 + $0x70] sm:$0x1] }
  0xc5   :  { %v875_v16 = vpop.f32.mrf.mxu0 }
  0xc7   :  { %v111_v17 = vpop.f32.mrf.mxu0 }
  0xe9   :  { %v26_v7 = vpop.permute.xlu0 %25 }
  0xea   :  { %v27_v8 = vsel %vm21_vm1, %v26_v7, %v20_v0  ;;  %v705_v0 = vld [vmem:[%s1118_s1 + $0x68] sm:$0xff] }
  0xeb   :  { %31 = vrot.lane.b32.xlu1 %v27_v8, %s954_s0 }
  0xef   :  { %196 = vperm.xlu1 %926, %v35_v9  }
 0x15d   :  { %v32_v15 = vpop.permute.xlu1 %31 }
 0x15e   :  { %877 = vmatpush3.msk.msra.mxu1 %vm1009_vm3, %v32_v15  ;;  %v723_v15 = vadd.s32 8, %v720_v13 }
 0x15f   :  { %879 = vmatmul.mubr.msk.f32.vlgmr.msra.gmra.mxu1 %vm38_vm0, %v120_v14  ;;  %886 = vmatprep.subr.mxu1 %v951_v3  ;;  %v719_v14 = vadd.s32 8, %v718_v12 }
 0x160   :  { %888 = vmatprep.mubr.msk.f32.mxu1 %vm952_vm2, %v951_v3  ;;  %vm724_vm9 = vcmp.lt.s32.totalorder %v718_v12, %v723_v15 }
 0x161   :  { %vm722_vm5 = vcmp.ge.s32.totalorder %v719_v14, %v720_v13  ;;  %vm725_vm6 = vcmp.lt.s32.totalorder %v719_v14, %v723_v15  ;;  %vm726_vm10 = vmand %vm721_vm8, %vm724_vm9 }
 0x162   :  { %vm727_vm7 = vmand %vm722_vm5, %vm725_vm6 }
 0x16a   :  { %v197_v19 = vpop.permute.xlu1 %196 }
 0x21f   :  { %v190_v18 = vpop.f32.mrf.mxu1 }
 0x220   :  { %v191_v20 = vadd.f32 %v190_v18, %v111_v17 }
 0x221   :  { %v880_v21 = vpop.f32.mrf.mxu1 }
 0x222   :  { %v199_v22 = vadd.f32 %v197_v19, %v191_v20 }
 0x224   :  { %v207_v23 = vmax.f32 %v199_v22, 0.0  ;;  %v715_v22 = vld [vmem:[%s1119_s2] sm:$0xff]  ;;  %s928_s2 = scalar_lea.vmem %s828_s20, 16 }
 0x225   :  { %p929_p0 = scmp.ne.s32.totalorder %s828_s20, %s928_s2  ;;  %p934_p2 = scmp.lt.s32.totalorder %s932_s21, %s928_s2 }
 0x226   :  { %208 = vrot.lane.b32.xlu0 %v207_v23, %s950_s14  ;;  %882 = vmatpush3.msra.mxu0 %v207_v23 }
 0x227   :  { %891 = vmatprep.subr.mxu0 %v951_v3  ;;  %884 = vmatmul.mubr.msk.f32.vlgmr.msra.gmra.mxu0 %vm38_vm0, %v220_v27  ;;  %p935_p3 = por %p934_p2, %p933_p1 }
 0x228   :  { %893 = vmatprep.mubr.msk.f32.mxu0 %vm952_vm2, %v951_v3 }
 0x229   :  { %p936_p4 = pnand %p935_p3, %p929_p0 }
 0x298   :  { %v209_v24 = vpop.permute.xlu0 %208 }
 0x299   :  { %v210_v25 = vsel %vm21_vm1, %v209_v24, %v207_v23 }
 0x29a   :  { %211 = vrot.lane.b32.xlu1 %v210_v25, %s950_s14 }
 0x29e   :  { %370 = vperm.xlu1 %926, %v367_v26  }
 0x2e7   :  { %v290_v33 = vpop.f32.mrf.mxu0 }
 0x2e9   :  { %v885_v34 = vpop.f32.mrf.mxu0 }
 0x30c   :  { %v212_v28 = vpop.permute.xlu1 %211 }
 0x30d   :  { %v213_v29 = vsel %vm21_vm1, %v212_v28, %v207_v23 }
 0x30e   :  { %215 = vrot.lane.b32.xlu0 %v213_v29, %s954_s0 }
 0x312   :  { %203 = vperm.xlu0 %927, %v200_v30  }
 0x319   :  { %v371_v36 = vpop.permute.xlu1 %370 }
 0x380   :  { %v216_v32 = vpop.permute.xlu0 %215 }
 0x381   :  { %887 = vmatpush3.msk.msra.mxu1 %vm1009_vm3, %v216_v32 }
 0x382   :  { %889 = vmatmul.mubr.msk.f32.vlgmr.msra.gmra.mxu1 %vm38_vm0, %v219_v31  ;;  %896 = vmatprep.subr.mxu1 %v951_v3 }
 0x383   :  { %898 = vmatprep.mubr.msk.f32.mxu1 %vm952_vm2, %v951_v3 }
 0x38d   :  { %v204_v38 = vpop.permute.xlu0 %203 }
 0x38e   :  { %v206_v41 = vadd.f32 %v875_v16, %v204_v38  ;;  %v956_v16 = vmov 1.0  }
 0x442   :  { %v363_v35 = vpop.f32.mrf.mxu1 }
 0x443   :  { %v364_v37 = vadd.f32 %v363_v35, %v290_v33 }
 0x444   :  { %v890_v39 = vpop.f32.mrf.mxu1 }
 0x445   :  { %v373_v40 = vadd.f32 %v371_v36, %v364_v37 }
 0x447   :  { %v374_v42 = vmax.f32 %v373_v40, 0.0 }
 0x449   :  { %v375_v43 = vadd.f32 %v374_v42, %v206_v41 }
 0x44b   :  { %v1049_v44 = vmax.f32 %v375_v43, 0.0 }
 0x44d   :  { %377 = vrot.lane.b32.xlu1 %v1049_v44, %s950_s14  ;;  %892 = vmatpush3.msra.mxu0 %v1049_v44 }
 0x44e   :  { %901 = vmatprep.subr.mxu0 %v951_v3  ;;  %894 = vmatmul.mubr.msk.f32.vlgmr.msra.gmra.mxu0 %vm38_vm0, %v392_v48 }
 0x44f   :  { %903 = vmatprep.mubr.msk.f32.mxu0 %vm952_vm2, %v951_v3 }
 0x4bf   :  { %v378_v45 = vpop.permute.xlu1 %377 }
 0x4c0   :  { %v379_v46 = vsel %vm21_vm1, %v378_v45, %v1049_v44 }
 0x4c1   :  { %380 = vrot.lane.b32.xlu1 %v379_v46, %s950_s14 }
 0x4c5   :  { %541 = vperm.xlu1 %926, %v390_v47  }
 0x50e   :  { %v462_v54 = vpop.f32.mrf.mxu0 }
 0x510   :  { %v895_v55 = vpop.f32.mrf.mxu0 }
 0x533   :  { %v381_v49 = vpop.permute.xlu1 %380 }
 0x534   :  { %v382_v50 = vsel %vm21_vm1, %v381_v49, %v1049_v44 }
 0x535   :  { %386 = vrot.lane.b32.xlu0 %v382_v50, %s955_s8 }
 0x540   :  { %v542_v58 = vpop.permute.xlu1 %541 }
 0x5a7   :  { %v387_v53 = vpop.permute.xlu0 %386 }
 0x5a8   :  { %897 = vmatpush3.msk.msra.mxu1 %vm1071_vm4, %v387_v53 }
 0x5a9   :  { %899 = vmatmul.mubr.msk.f32.vlgmr.msra.gmra.mxu1 %vm38_vm0, %v391_v52  ;;  %906 = vmatprep.subr.mxu1 %v951_v3 }
 0x5aa   :  { %908 = vmatprep.mubr.msk.f32.mxu1 %vm952_vm2, %v951_v3 }
 0x669   :  { %v535_v56 = vpop.f32.mrf.mxu1 }
 0x66a   :  { %v536_v57 = vadd.f32 %v535_v56, %v462_v54 }
 0x66b   :  { %v900_v59 = vpop.f32.mrf.mxu1 }
 0x66c   :  { %v544_v60 = vadd.f32 %v542_v58, %v536_v57 }
 0x66e   :  { %v545_v61 = vmax.f32 %v544_v60, 0.0 }
 0x670   :  { %546 = vrot.lane.b32.xlu0 %v545_v61, %s950_s14  ;;  %902 = vmatpush3.msra.mxu0 %v545_v61 }
 0x671   :  { %911 = vmatprep.subr.mxu0 %v951_v3  ;;  %904 = vmatmul.mubr.msk.f32.vlgmr.msra.gmra.mxu0 %vm38_vm0, %v558_v1 }
 0x672   :  { %915 = vmatprep.mubr.msk.f32.mxu0 %vm952_vm2, %v951_v3  ;;  %912 = vmatpush3.msk.msra.mxu0 %vm727_vm7, %v956_v16 }
 0x673   :  { %913 = vmatprep.subr.mxu0 %v951_v3 }
 0x674   :  { %914 = vmatpush3.msk.msra.mxu0 %vm726_vm10, %v956_v16 }
 0x6e2   :  { %v547_v62 = vpop.permute.xlu0 %546 }
 0x6e3   :  { %v548_v63 = vsel %vm21_vm1, %v547_v62, %v545_v61 }
 0x6e4   :  { %549 = vrot.lane.b32.xlu1 %v548_v63, %s950_s14 }
 0x6e8   :  { %708 = vperm.xlu1 %926, %v705_v0  }
 0x731   :  { %v628_v8 = vpop.f32.mrf.mxu0 }
 0x733   :  { %v905_v9 = vpop.f32.mrf.mxu0 }
 0x756   :  { %v550_v2 = vpop.permute.xlu1 %549 }
 0x757   :  { %v551_v4 = vsel %vm21_vm1, %v550_v2, %v545_v61 }
 0x758   :  { %553 = vrot.lane.b32.xlu0 %v551_v4, %s955_s8 }
 0x75c   :  { %815 = vperm.xlu0 %927, %v804_v5  }
 0x763   :  { %v709_v19 = vpop.permute.xlu1 %708 }
 0x7ca   :  { %v554_v7 = vpop.permute.xlu0 %553 }
 0x7cb   :  { %907 = vmatpush3.msk.msra.mxu1 %vm1071_vm4, %v554_v7 }
 0x7cc   :  { %909 = vmatmul.mubr.msk.f32.vlgmr.msra.gmra.mxu1 %vm38_vm0, %v557_v6 }
 0x7d7   :  { %v816_v33 = vpop.permute.xlu0 %815 }
 0x88c   :  { %v701_v17 = vpop.f32.mrf.mxu1 }
 0x88d   :  { %v702_v18 = vadd.f32 %v701_v17, %v628_v8 }
 0x88e   :  { %v910_v20 = vpop.f32.mrf.mxu1 }
 0x88f   :  { %v711_v10 = vadd.f32 %v709_v19, %v702_v18 }
 0x891   :  { %v712_v21 = vmax.f32 %v711_v10, 0.0 }
 0x893   :  { %v713_v11 = vadd.f32 %v712_v21, %v1049_v44 }
 0x895   :  { %v714_v23 = vmax.f32 %v713_v11, 0.0 }
 0x897   :  { %v716_v24 = vmul.f32 %v715_v22, %v714_v23 }
 0x899   :  { %916 = vmatmul.mubr.msk.f32.vlgmr.msra.gmra.mxu0 %vm730_vm11, %v716_v24 }
 0x959   :  { %v800_v3 = vpop.f32.mrf.mxu0 }
 0x95a   :  { %v806_v25 = vsel %vm805_vm12, %v800_v3, 0.0 }
 0x95b   :  { %v807_v26 = vrot.slane %v806_v25, 4  ;;  %v917_v27 = vpop.f32.mrf.mxu0 }
 0x95d   :  { %v808_v28 = vadd.f32 %v807_v26, %v806_v25 }
 0x95f   :  { %v809_v29 = vrot.slane %v808_v28, 2 }
 0x961   :  { %v810_v30 = vadd.f32 %v809_v29, %v808_v28 }
 0x963   :  { %v811_v31 = vrot.slane %v810_v30, 1 }
 0x965   :  { %v812_v32 = vadd.f32 %v811_v31, %v810_v30 }
 0x967   :  { %v818_v34 = vadd.f32 %v816_v33, %v812_v32 }
 0x969   :  { %820 = vst.msk [vmem:[#allocation2] sm:$0x1] %vm819_vm13, %v818_v34 }
 0x96a   :  { %939 = shalt.err (!%p936_p4)
}
 0x96b   :  { %830 = dma.vmem_to_hbm [thread:$0]  %s828_s20, 16, %s1120_s3, [#allocation3]  }
 0x96c   :  { %948 = dma.done.wait [#allocation3], 16  }
 0x96d   :  { %949 = vsyncadd [#allocation3], 4294967280 }
 0x96e   :  { %834 = vsyncpa [#allocation3], 1 }

</bundles_post_ra>
